<compile_context>
chip_gen: v6e
topology: v6e:2x2x1
jax: 0.10.0
libtpu: 0.0.40
codegen_flags: <defaults>
</compile_context>

<pallas_src>
import functools

import jax
import jax.numpy as jnp
from jax.experimental import pallas as pl
from jax.experimental.pallas import tpu as pltpu

SMOOTH = 0.2
LANES = 128
_DEFAULT_BLOCK_BYTES = 2 * 1024 * 1024  # per-input block budget (before double-buffering)


def _recall_kernel(x_ref, t_ref, out_ref, inter_acc, tsum_acc, *, d128, s, ragged):
    """Grid = (row_block, feature_tile); reduces the folded feature axis.

    x_ref / t_ref blocks : (bn, s, 128) in the caller's dtype.
    out_ref block        : (bn, 1, 128) f32 (per-row recall broadcast over lanes).
    inter_acc / tsum_acc : (bn, 128) f32 lane-dense running partials.
    """
    j = pl.program_id(1)

    @pl.when(j == 0)
    def _():
        inter_acc[...] = jnp.zeros_like(inter_acc)
        tsum_acc[...] = jnp.zeros_like(tsum_acc)

    x = x_ref[...].astype(jnp.float32)  # (bn, s, 128)
    t = t_ref[...].astype(jnp.float32)
    xt = x * t
    if ragged:
        # Mask sublanes past the end of the lane-folded feature axis (only
        # traced when the last feature tile overhangs the array).
        sub = jax.lax.broadcasted_iota(jnp.int32, x.shape, 1)
        valid = (j * s + sub) < d128
        xt = jnp.where(valid, xt, 0.0)
        t = jnp.where(valid, t, 0.0)

    # Partial (sublane) reduce inside the block, then accumulate into the tiny
    # lane-dense scratch.  The cross-lane reduce is deferred to the last tile.
    inter_acc[...] += jnp.sum(xt, axis=1)
    tsum_acc[...] += jnp.sum(t, axis=1)

    @pl.when(j == pl.num_programs(1) - 1)
    def _():
        inter = jnp.sum(inter_acc[...], axis=1, keepdims=True)  # (bn, 1)
        tsum = jnp.sum(tsum_acc[...], axis=1, keepdims=True)    # (bn, 1)
        rec = (inter + SMOOTH) / (tsum + SMOOTH)                 # (bn, 1)
        out_ref[...] = jnp.broadcast_to(rec[:, :, None], out_ref.shape)


def _largest_divisor_leq(n, cap):
    cap = int(max(1, min(n, cap)))
    for d in range(cap, 0, -1):
        if n % d == 0:
            return d
    return 1


@functools.partial(jax.jit, static_argnames=("block_bytes",))
def recall_loss(inp, target, block_bytes=_DEFAULT_BLOCK_BYTES):
    """Pallas implementation of recall_Loss.forward(input, target)."""
    N = target.shape[0]
    # Keep the original dtype through HBM; the cast happens inside the kernel.
    x = inp.reshape(N, -1)
    t = target.reshape(N, -1)
    D = x.shape[1]

    # Fold the feature dim into (sublane, lane) so vregs / DMA tiles are dense.
    # When D % 128 == 0 (typical C*H*W) the reshape is free; otherwise pad
    # minimally to the next lane multiple (zeros do not change either sum).
    d128 = pl.cdiv(D, LANES)
    if d128 * LANES != D:
        pad = d128 * LANES - D
        x = jnp.pad(x, ((0, 0), (0, pad)))
        t = jnp.pad(t, ((0, 0), (0, pad)))
    x3 = x.reshape(N, d128, LANES)
    t3 = t.reshape(N, d128, LANES)

    itemsize = jnp.dtype(x3.dtype).itemsize
    row_bytes = d128 * LANES * itemsize

    if row_bytes <= block_bytes:
        # A full row fits in one block: no feature tiling; pack several rows
        # per grid step instead (helps small-D / large-N cases).
        s = d128
        grid_d = 1
        bn = _largest_divisor_leq(N, block_bytes // max(row_bytes, 1))
        ragged = False
    else:
        # Large rows: tile the folded feature axis, one row per step.
        bn = 1
        s = max(8, (block_bytes // (LANES * itemsize)) // 8 * 8)
        s = min(s, d128)
        grid_d = pl.cdiv(d128, s)
        ragged = (d128 % s) != 0

    kernel = functools.partial(_recall_kernel, d128=d128, s=s, ragged=ragged)

    out = pl.pallas_call(
        kernel,
        out_shape=jax.ShapeDtypeStruct((N, 1, LANES), jnp.float32),
        grid_spec=pltpu.PrefetchScalarGridSpec(
            num_scalar_prefetch=0,
            grid=(N // bn, grid_d),
            in_specs=[
                pl.BlockSpec((bn, s, LANES), lambda i, j: (i, j, 0)),
                pl.BlockSpec((bn, s, LANES), lambda i, j: (i, j, 0)),
            ],
            out_specs=pl.BlockSpec((bn, 1, LANES), lambda i, j: (i, 0, 0)),
            scratch_shapes=[
                pltpu.VMEM((bn, LANES), jnp.float32),
                pltpu.VMEM((bn, LANES), jnp.float32),
            ],
        ),
        compiler_params=pltpu.CompilerParams(
            dimension_semantics=("parallel", "arbitrary"),
            vmem_limit_bytes=32 * 1024 * 1024,
        ),
    )(x3, t3)

    # Tiny glue: per-row recall (lane 0) -> 1 - mean over rows.
    rec = out[:, 0, 0]
    return 1.0 - jnp.sum(rec) / N


def _reference(inp, target):
    N = target.shape[0]
    xf = inp.reshape(N, -1).astype(jnp.float32)
    tf = target.reshape(N, -1).astype(jnp.float32)
    inter = jnp.sum(xf * tf, axis=1)
    rec = (inter + SMOOTH) / (jnp.sum(tf, axis=1) + SMOOTH)
    return 1.0 - jnp.mean(rec)


if __name__ == "__main__":
    key = jax.random.PRNGKey(0)
    k1, k2, k3, k4 = jax.random.split(key, 4)

    # Primary case: (N, C, H, W) = (2, 4, 16, 16) — lane-aligned feature dim,
    # full rows packed per block, single grid step.
    N, C, H, W = 2, 4, 16, 16
    inp = jax.nn.sigmoid(jax.random.normal(k1, (N, C, H, W), dtype=jnp.float32))
    target = (jax.random.uniform(k2, (N, C, H, W)) > 0.5).astype(jnp.float32)
    loss = jax.block_until_ready(recall_loss(inp, target))
    ref = _reference(inp, target)
    assert jnp.allclose(loss, ref, atol=1e-5, rtol=1e-5), (loss, ref)

    # Secondary case: non-lane-aligned feature dim (pad path) plus a tiny block
    # budget to force feature tiling with a ragged last tile (mask path).
    N2, C2, H2, W2 = 2, 9, 16, 17  # D = 2448 -> d128 = 20, s = 8 -> ragged
    inp2 = jax.nn.sigmoid(jax.random.normal(k3, (N2, C2, H2, W2), dtype=jnp.float32))
    target2 = (jax.random.uniform(k4, (N2, C2, H2, W2)) > 0.5).astype(jnp.float32)
    loss2 = jax.block_until_ready(recall_loss(inp2, target2, block_bytes=2048))
    ref2 = _reference(inp2, target2)
    assert jnp.allclose(loss2, ref2, atol=1e-5, rtol=1e-5), (loss2, ref2)

    print("KERNEL_OK")
</pallas_src>

<mosaic_0001>
module attributes {stable_mosaic.version = 11 : i64} {
  func.func @_recall_kernel(%arg0: i32, %arg1: i32, %arg2: memref<2x8x128xf32, #tpu.memory_space<vmem>>, %arg3: memref<2x8x128xf32, #tpu.memory_space<vmem>>, %arg4: memref<2x1x128xf32, #tpu.memory_space<vmem>>, %arg5: memref<2x128xf32, #tpu.memory_space<vmem>>, %arg6: memref<2x128xf32, #tpu.memory_space<vmem>>) attributes {dimension_semantics = [#tpu.dimension_semantics<parallel>, #tpu.dimension_semantics<arbitrary>], iteration_bounds = array<i64: 1, 1>, scalar_prefetch = 0 : i64, scratch_operands = 2 : i64, tpu.core_type = #tpu.core_type<tc>, window_params = [{transform_indices = @transform_0, window_bounds = array<i64: 2, 8, 128>}, {transform_indices = @transform_1, window_bounds = array<i64: 2, 8, 128>}, {transform_indices = @transform_2, window_bounds = array<i64: 2, 1, 128>}]} {
    %c0_i32 = arith.constant 0 : i32
    %0 = arith.cmpi eq, %arg1, %c0_i32 : i32
    %1 = arith.extui %0 : i1 to i32
    %c0_i32_0 = arith.constant 0 : i32
    %2 = arith.cmpi ne, %1, %c0_i32_0 : i32
    scf.if %2 {
      %cst_17 = arith.constant 0.000000e+00 : f32
      %17 = vector.broadcast %cst_17 : f32 to vector<2x128xf32>
      %c0_18 = arith.constant 0 : index
      %c0_19 = arith.constant 0 : index
      %18 = vector.load %arg5[%c0_18, %c0_19] : memref<2x128xf32, #tpu.memory_space<vmem>>, vector<2x128xf32>
      tpu.vector_store %arg5[%c0_18, %c0_19], %17 {strides = array<i32>} : memref<2x128xf32, #tpu.memory_space<vmem>>, vector<2x128xf32>,
      %cst_20 = arith.constant 0.000000e+00 : f32
      %19 = vector.broadcast %cst_20 : f32 to vector<2x128xf32>
      %c0_21 = arith.constant 0 : index
      %c0_22 = arith.constant 0 : index
      %20 = vector.load %arg6[%c0_21, %c0_22] : memref<2x128xf32, #tpu.memory_space<vmem>>, vector<2x128xf32>
      tpu.vector_store %arg6[%c0_21, %c0_22], %19 {strides = array<i32>} : memref<2x128xf32, #tpu.memory_space<vmem>>, vector<2x128xf32>,
    } else {
    }
    %c0 = arith.constant 0 : index
    %c0_1 = arith.constant 0 : index
    %c0_2 = arith.constant 0 : index
    %3 = vector.load %arg2[%c0, %c0_1, %c0_2] : memref<2x8x128xf32, #tpu.memory_space<vmem>>, vector<2x8x128xf32>
    %c0_3 = arith.constant 0 : index
    %c0_4 = arith.constant 0 : index
    %c0_5 = arith.constant 0 : index
    %4 = vector.load %arg3[%c0_3, %c0_4, %c0_5] : memref<2x8x128xf32, #tpu.memory_space<vmem>>, vector<2x8x128xf32>
    %5 = arith.mulf %3, %4 : vector<2x8x128xf32>
    %c0_6 = arith.constant 0 : index
    %c0_7 = arith.constant 0 : index
    %6 = vector.load %arg5[%c0_6, %c0_7] : memref<2x128xf32, #tpu.memory_space<vmem>>, vector<2x128xf32>
    %cst = arith.constant dense<0.000000e+00> : vector<2x128xf32>
    %7 = vector.multi_reduction <add>, %5, %cst [1] : vector<2x8x128xf32> to vector<2x128xf32>
    %8 = arith.addf %6, %7 : vector<2x128xf32>
    %c0_8 = arith.constant 0 : index
    %c0_9 = arith.constant 0 : index
    %9 = vector.load %arg5[%c0_8, %c0_9] : memref<2x128xf32, #tpu.memory_space<vmem>>, vector<2x128xf32>
    tpu.vector_store %arg5[%c0_8, %c0_9], %8 {strides = array<i32>} : memref<2x128xf32, #tpu.memory_space<vmem>>, vector<2x128xf32>,
    %c0_10 = arith.constant 0 : index
    %c0_11 = arith.constant 0 : index
    %10 = vector.load %arg6[%c0_10, %c0_11] : memref<2x128xf32, #tpu.memory_space<vmem>>, vector<2x128xf32>
    %cst_12 = arith.constant dense<0.000000e+00> : vector<2x128xf32>
    %11 = vector.multi_reduction <add>, %4, %cst_12 [1] : vector<2x8x128xf32> to vector<2x128xf32>
    %12 = arith.addf %10, %11 : vector<2x128xf32>
    %c0_13 = arith.constant 0 : index
    %c0_14 = arith.constant 0 : index
    %13 = vector.load %arg6[%c0_13, %c0_14] : memref<2x128xf32, #tpu.memory_space<vmem>>, vector<2x128xf32>
    tpu.vector_store %arg6[%c0_13, %c0_14], %12 {strides = array<i32>} : memref<2x128xf32, #tpu.memory_space<vmem>>, vector<2x128xf32>,
    %c0_i32_15 = arith.constant 0 : i32
    %14 = arith.cmpi eq, %arg1, %c0_i32_15 : i32
    %15 = arith.extui %14 : i1 to i32
    %c0_i32_16 = arith.constant 0 : i32
    %16 = arith.cmpi ne, %15, %c0_i32_16 : i32
    scf.if %16 {
      %c0_17 = arith.constant 0 : index
      %c0_18 = arith.constant 0 : index
      %17 = vector.load %arg5[%c0_17, %c0_18] : memref<2x128xf32, #tpu.memory_space<vmem>>, vector<2x128xf32>
      %cst_19 = arith.constant dense<0.000000e+00> : vector<2xf32>
      %18 = vector.multi_reduction <add>, %17, %cst_19 [1] : vector<2x128xf32> to vector<2xf32>
      %19 = vector.shape_cast %18 : vector<2xf32> to vector<2x1xf32>
      %c0_20 = arith.constant 0 : index
      %c0_21 = arith.constant 0 : index
      %20 = vector.load %arg6[%c0_20, %c0_21] : memref<2x128xf32, #tpu.memory_space<vmem>>, vector<2x128xf32>
      %cst_22 = arith.constant dense<0.000000e+00> : vector<2xf32>
      %21 = vector.multi_reduction <add>, %20, %cst_22 [1] : vector<2x128xf32> to vector<2xf32>
      %22 = vector.shape_cast %21 : vector<2xf32> to vector<2x1xf32>
      %cst_23 = arith.constant 2.000000e-01 : f32
      %23 = vector.broadcast %cst_23 : f32 to vector<2x1xf32>
      %24 = arith.addf %19, %23 : vector<2x1xf32>
      %cst_24 = arith.constant 2.000000e-01 : f32
      %25 = vector.broadcast %cst_24 : f32 to vector<2x1xf32>
      %26 = arith.addf %22, %25 : vector<2x1xf32>
      %27 = arith.divf %24, %26 : vector<2x1xf32>
      %28 = vector.shape_cast %27 : vector<2x1xf32> to vector<2x1x1xf32>
      %29 = vector.shape_cast %28 : vector<2x1x1xf32> to vector<2x1x1xf32>
      %30 = vector.broadcast %29 : vector<2x1x1xf32> to vector<2x1x128xf32>
      %c0_25 = arith.constant 0 : index
      %c0_26 = arith.constant 0 : index
      %c0_27 = arith.constant 0 : index
      %31 = vector.load %arg4[%c0_25, %c0_26, %c0_27] : memref<2x1x128xf32, #tpu.memory_space<vmem>>, vector<2x1x128xf32>
      tpu.vector_store %arg4[%c0_25, %c0_26, %c0_27], %30 {strides = array<i32>} : memref<2x1x128xf32, #tpu.memory_space<vmem>>, vector<2x1x128xf32>,
    } else {
    }
    return
  }
  func.func @transform_0(%arg0: i32, %arg1: i32) -> (i32, i32, i32) {
    %c0_i32 = arith.constant 0 : i32
    %c0_i32_0 = arith.constant 0 : i32
    return %arg0, %arg1, %c0_i32 : i32, i32, i32
  }
  func.func @transform_1(%arg0: i32, %arg1: i32) -> (i32, i32, i32) {
    %c0_i32 = arith.constant 0 : i32
    %c0_i32_0 = arith.constant 0 : i32
    return %arg0, %arg1, %c0_i32 : i32, i32, i32
  }
  func.func @transform_2(%arg0: i32, %arg1: i32) -> (i32, i32, i32) {
    %c0_i32 = arith.constant 0 : i32
    %c0_i32_0 = arith.constant 0 : i32
    %c0_i32_1 = arith.constant 0 : i32
    return %arg0, %c0_i32, %c0_i32_0 : i32, i32, i32
  }
}

</mosaic_0001>

<bundles_post_ra>
// kernel: recall_loss.1
= control target key start
LH: loop header
LB: loop body
LE: loop exit
PB: predicated region body
PF: predicated region fallthrough
CT: control target
= control target key end

     0   :  { %v98_v0 = vmov 0.0   ;;  %vm38_vm0 = vcmask 1041409   ;;  %vm66_vm1 = vcmask 1041408   ;;  %v79_v43 = vlaneseq  ;;  %s132_s1 = inlined_call_operand.vmem [shape: f32[2,8,128], index: 1, kind: input, shape index: {}]   ;;  %s133_s0 = inlined_call_operand.vmem [shape: f32[2,8,128], index: 0, kind: input, shape index: {}]   ;;  %s134_s2 = inlined_call_operand.vmem [shape: f32[2,1,128], index: 2, kind: output, shape index: {}]  }
   0x1   :  { %16 = vst [vmem:[#allocation3] sm:$0x3] %v98_v0  ;;  %v19_v1 = vld [vmem:[%s132_s1] sm:$0xff]  ;;  %v20_v2 = vld [vmem:[%s132_s1 + $0x8] sm:$0xff]  ;;  %15 = vst [vmem:[#allocation2] sm:$0x3] %v98_v0 }
   0x2   :  { %v17_v3 = vld [vmem:[%s133_s0] sm:$0xff]  ;;  %v44_v4 = vrot.slane %v19_v1, 4  ;;  %v50_v5 = vrot.slane %v20_v2, 4  ;;  %v18_v6 = vld [vmem:[%s133_s0 + $0x8] sm:$0xff]  ;;  %v80_v45 = vshrl.u32 %v79_v43, 7 }
   0x3   :  { %v21_v7 = vmul.f32 %v19_v1, %v17_v3  ;;  %v22_v8 = vmul.f32 %v20_v2, %v18_v6 }
   0x4   :  { %v45_v9 = vadd.f32 %v44_v4, %v19_v1  ;;  %v51_v10 = vadd.f32 %v50_v5, %v20_v2  ;;  %v81_v47 = vsub.s32 0, %v80_v45  ;;  %v85_v48 = vsub.s32 1, %v80_v45 }
   0x5   :  { %v24_v11 = vrot.slane %v21_v7, 4  ;;  %v30_v12 = vrot.slane %v22_v8, 4 }
   0x6   :  { %v46_v13 = vrot.slane %v45_v9, 2  ;;  %v52_v14 = vrot.slane %v51_v10, 2 }
   0x7   :  { %v25_v15 = vadd.f32 %v24_v11, %v21_v7  ;;  %v31_v16 = vadd.f32 %v30_v12, %v22_v8 }
   0x8   :  { %v47_v17 = vadd.f32 %v46_v13, %v45_v9  ;;  %v53_v18 = vadd.f32 %v52_v14, %v51_v10  ;;  %v43_v25 = vld [vmem:[#allocation3] sm:$0x3]  ;;  %v23_v33 = vld [vmem:[#allocation2] sm:$0x3] }
   0x9   :  { %v26_v19 = vrot.slane %v25_v15, 2  ;;  %v32_v20 = vrot.slane %v31_v16, 2 }
   0xa   :  { %v48_v21 = vrot.slane %v47_v17, 1  ;;  %v54_v22 = vrot.slane %v53_v18, 1 }
   0xb   :  { %v27_v23 = vadd.f32 %v26_v19, %v25_v15  ;;  %v33_v24 = vadd.f32 %v32_v20, %v31_v16 }
   0xc   :  { %v49_v26 = vadd.f32 %v48_v21, %v47_v17  ;;  %v55_v27 = vadd.f32 %v54_v22, %v53_v18 }
   0xd   :  { %v28_v28 = vrot.slane %v27_v23, 1  ;;  %v34_v29 = vrot.slane %v33_v24, 1 }
   0xe   :  { %v58_v30 = vsel %vm38_vm0, %v55_v27, %v49_v26 }
   0xf   :  { %v29_v31 = vadd.f32 %v28_v28, %v27_v23  ;;  %v60_v32 = vadd.f32 %v58_v30, %v43_v25  ;;  %v35_v34 = vadd.f32 %v34_v29, %v33_v24 }
  0x11   :  { %61 = vst [vmem:[#allocation3] sm:$0x3] %v60_v32  ;;  %v39_v35 = vsel %vm38_vm0, %v35_v34, %v29_v31 }
  0x12   :  { %v41_v36 = vadd.f32 %v39_v35, %v23_v33 }
  0x14   :  { %42 = vst [vmem:[#allocation2] sm:$0x3] %v41_v36 }
  0x18   :  { %v70_v37 = vld [vmem:[#allocation3] sm:$0x3] }
  0x19   :  { %v71_v38 = vsel %vm66_vm1, %v70_v37, 0.0 }
  0x1a   :  { %72 = vadd.xlane.f32.xlu0 %v71_v38 }
  0x1b   :  { %v65_v39 = vld [vmem:[#allocation2] sm:$0x3] }
  0x1c   :  { %v67_v40 = vsel %vm66_vm1, %v65_v39, 0.0 }
  0x1e   :  { %68 = vadd.xlane.f32.xlu0 %v67_v40 }
  0xa3   :  { %v73_v41 = vpop.xlane.xlu0 %72 }
  0xa4   :  { %v75_v42 = vadd.f32 0.2, %v73_v41 }
  0xa6   :  { %96 = vrcp.f32 %v75_v42 }
  0xa7   :  { %v69_v44 = vpop.xlane.xlu0 %68 }
  0xa8   :  { %v74_v46 = vadd.f32 0.2, %v69_v44 }
  0xb3   :  { %v97_v49 = vpop.eup %96 }
  0xb4   :  { %v77_v50 = vmul.f32 %v97_v49, %v74_v46 }
  0xb6   :  { %v82_v51 = vrot.slane %v77_v50, %v81_v47  ;;  %v86_v52 = vrot.slane %v77_v50, %v85_v48 }
  0xb8   :  { %89 = vst [vmem:[%s134_s2] sm:$0x1] %v82_v51  ;;  %90 = vst [vmem:[%s134_s2 + $0x1] sm:$0x1] %v86_v52 }

</bundles_post_ra>
